<compile_context>
chip_gen: v7x
topology: tpu7x:2x2x1
jax: 0.10.0
libtpu: 0.0.40
codegen_flags: <defaults>
</compile_context>

<pallas_src>
import jax
import jax.numpy as jnp
from jax import lax
from jax.experimental import pallas as pl
from jax.experimental.pallas import tpu as pltpu


def _round_up(x: int, m: int) -> int:
    return (x + m - 1) // m * m


def _sublane_multiple(dtype) -> int:
    # Native sublane packing: f32 -> 8, bf16 -> 16, int8/fp8 -> 32.
    return {4: 8, 2: 16, 1: 32}.get(jnp.dtype(dtype).itemsize, 8)


def _vmem_capacity_bytes() -> int:
    try:
        return int(pltpu.get_tpu_info().vmem_capacity_bytes)
    except Exception:
        return 64 * 1024 * 1024  # conservative fallback (v7x per-TC VMEM)


# ---------------------------------------------------------------------------
# Kernels
# ---------------------------------------------------------------------------

def _scaling_linear_kernel(x_ref, s_ref, w_ref, b_ref, o_ref, xs_ref):
    """One (tm, tn) output tile of y = (x * in_scaler) @ W_t + b.

    W_t is the pre-transposed (in_dim, tn) weight tile (K-major).  The scaled
    activations are computed once per x row-block: the x block index is
    constant along the inner j (N) axis, so the xs scratch stays valid for all
    N tiles of the same row-block.  Scale multiply in f32, one cast to the
    compute dtype, f32 MXU accumulation, f32 bias add, cast on store.
    """
    @pl.when(pl.program_id(1) == 0)
    def _():
        xs_ref[...] = (x_ref[...].astype(jnp.float32)
                       * s_ref[...]).astype(xs_ref.dtype)

    acc = lax.dot_general(
        xs_ref[...], w_ref[...],
        dimension_numbers=(((1,), (0,)), ((), ())),      # (tm, K) @ (K, tn)
        preferred_element_type=jnp.float32,
    )
    o_ref[...] = (acc + b_ref[...]).astype(o_ref.dtype)


def _scaling_linear_kernel_ksplit(x_ref, s_ref, w_ref, b_ref, o_ref, acc_ref):
    """K-split variant for very wide adapters: f32 VMEM accumulator over the
    K grid axis (last, 'arbitrary'); bias add + cast on the final K step."""
    k = pl.program_id(2)

    @pl.when(k == 0)
    def _():
        acc_ref[...] = jnp.zeros_like(acc_ref)

    xs = (x_ref[...].astype(jnp.float32) * s_ref[...]).astype(w_ref.dtype)
    acc_ref[...] += lax.dot_general(
        xs, w_ref[...],
        dimension_numbers=(((1,), (0,)), ((), ())),
        preferred_element_type=jnp.float32,
    )

    @pl.when(k == pl.num_programs(2) - 1)
    def _():
        o_ref[...] = (acc_ref[...] + b_ref[...]).astype(o_ref.dtype)


# ---------------------------------------------------------------------------
# Wrapper
# ---------------------------------------------------------------------------

def scaling_adapter_forward(x, in_scaler, w, b, *, tm=512, tn=256, tk=2048,
                            compute_dtype=jnp.bfloat16, out_dtype=None,
                            vmem_budget_bytes=None, _force_path=None):
    """x: (..., in_dim) -> (..., out_dim).

    w: (out_dim, in_dim) PyTorch layout, b: (out_dim,), in_scaler: (in_dim,).
    out_dtype defaults to x.dtype (pass bf16 to halve HBM writeback; opt-in).
    """
    orig_shape = x.shape
    in_dim = int(orig_shape[-1])
    out_dim = int(w.shape[0])

    M = 1
    for d in orig_shape[:-1]:
        M *= int(d)
    M = max(M, 1)

    if out_dtype is None:
        out_dtype = x.dtype
    cdt = jnp.dtype(compute_dtype) if compute_dtype is not None else jnp.dtype(x.dtype)
    x_isz = jnp.dtype(x.dtype).itemsize
    c_isz = cdt.itemsize
    o_isz = jnp.dtype(out_dtype).itemsize

    # Per-generation VMEM budget (v7x: 64 MiB, v5e/v6e: 128 MiB physical).
    vmem_cap = _vmem_capacity_bytes()
    if vmem_budget_bytes is None:
        vmem_budget_bytes = vmem_cap * 3 // 4        # headroom for compiler scratch

    sub = _sublane_multiple(cdt)
    lane = 128
    N_full = _round_up(out_dim, lane)
    tm0 = _round_up(min(tm, M), sub)

    # Per-grid-step VMEM footprints (double-buffered pipeline buffers + scratch).
    def fp_nosplit(tm_, tn_):
        return (2 * tm_ * in_dim * x_isz          # x block (native dtype)
                + 2 * in_dim * tn_ * c_isz        # W^T block (compute dtype)
                + 2 * tn_ * 4 + 2 * in_dim * 4    # bias + scale (f32)
                + 2 * tm_ * tn_ * o_isz           # output block
                + tm_ * in_dim * c_isz)           # xs scratch

    def fp_ksplit(tm_, tn_, tk_):
        return (2 * tm_ * tk_ * x_isz
                + 2 * tk_ * tn_ * c_isz
                + 2 * tn_ * 4 + 2 * tk_ * 4
                + 2 * tm_ * tn_ * o_isz
                + tm_ * tn_ * 4)                  # f32 accumulator scratch

    def fit_tm(tm_start, fp):
        t = tm_start
        while t > sub and fp(t) > vmem_budget_bytes:
            t = max(sub, _round_up(t // 2, sub))
        return t

    def pick_resident():
        t = fit_tm(tm0, lambda t_: fp_nosplit(t_, N_full))
        return t, N_full

    def pick_tiled():
        tn_ = min(_round_up(min(tn, out_dim), lane), N_full)
        t = fit_tm(tm0, lambda t_: fp_nosplit(t_, tn_))
        return t, tn_

    def pick_ksplit():
        tk_ = min(_round_up(min(tk, in_dim), lane), _round_up(in_dim, lane))
        tn_ = min(_round_up(min(tn, out_dim), lane), N_full)
        t = fit_tm(tm0, lambda t_: fp_ksplit(t_, tn_, tk_))
        return t, tn_, tk_

    path = _force_path
    if path is None:
        tm_floor = min(tm0, _round_up(min(256, M), sub))
        tm_r, tn_r = pick_resident()
        if fp_nosplit(tm_r, tn_r) <= vmem_budget_bytes and tm_r >= tm_floor:
            path = "resident"          # W DMA'd once, stays fully VMEM-resident
        else:
            tm_t, tn_t = pick_tiled()
            if fp_nosplit(tm_t, tn_t) <= vmem_budget_bytes and tm_t >= tm_floor:
                path = "tiled"
            else:
                path = "ksplit"        # very wide in_dim: split the K axis

    # ---- one-time operand prep (outside the grid) ---------------------------
    x2 = x.reshape(M, in_dim)                        # native dtype; scaled in-kernel
    s2 = in_scaler.reshape(1, in_dim).astype(jnp.float32)
    wt = jnp.transpose(w).astype(cdt)                # (in_dim, out_dim), K-major
    b2 = b.reshape(1, out_dim).astype(jnp.float32)

    flops = 2 * M * in_dim * out_dim + M * in_dim

    if path in ("resident", "tiled"):
        tm_sel, tn_sel = pick_resident() if path == "resident" else pick_tiled()
        M_pad = _round_up(M, tm_sel)
        N_pad = _round_up(out_dim, tn_sel)
        if M_pad != M:
            x2 = jnp.pad(x2, ((0, M_pad - M), (0, 0)))
        if N_pad != out_dim:
            wt = jnp.pad(wt, ((0, 0), (0, N_pad - out_dim)))
            b2 = jnp.pad(b2, ((0, 0), (0, N_pad - out_dim)))

        grid = (M_pad // tm_sel, N_pad // tn_sel)
        w_reads = 1 if grid[1] == 1 else grid[0]     # resident vs per-row-block
        cost = pl.CostEstimate(
            flops=flops, transcendentals=0,
            bytes_accessed=(M_pad * in_dim * x_isz
                            + w_reads * in_dim * N_pad * c_isz
                            + M_pad * N_pad * o_isz
                            + in_dim * 4 + N_pad * 4))
        vmem_limit = int(min(vmem_cap,
                             max(32 * 1024 * 1024,
                                 2 * fp_nosplit(tm_sel, tn_sel))))

        out2 = pl.pallas_call(
            _scaling_linear_kernel,
            out_shape=jax.ShapeDtypeStruct((M_pad, N_pad), out_dtype),
            grid_spec=pltpu.PrefetchScalarGridSpec(
                num_scalar_prefetch=0,
                grid=grid,
                in_specs=[
                    pl.BlockSpec((tm_sel, in_dim), lambda i, j: (i, 0)),   # x rows
                    pl.BlockSpec((1, in_dim), lambda i, j: (0, 0)),        # scale
                    pl.BlockSpec((in_dim, tn_sel), lambda i, j: (0, j)),   # W^T tile
                    pl.BlockSpec((1, tn_sel), lambda i, j: (0, j)),        # bias tile
                ],
                out_specs=pl.BlockSpec((tm_sel, tn_sel), lambda i, j: (i, j)),
                scratch_shapes=[pltpu.VMEM((tm_sel, in_dim), cdt)],
            ),
            compiler_params=pltpu.CompilerParams(
                # inner j axis carries the xs scratch state -> keep sequential.
                dimension_semantics=("parallel", "arbitrary"),
                vmem_limit_bytes=vmem_limit,
            ),
            cost_estimate=cost,
        )(x2, s2, wt, b2)

    else:  # "ksplit"
        tm_sel, tn_sel, tk_sel = pick_ksplit()
        M_pad = _round_up(M, tm_sel)
        N_pad = _round_up(out_dim, tn_sel)
        K_pad = _round_up(in_dim, tk_sel)
        x2 = jnp.pad(x2, ((0, M_pad - M), (0, K_pad - in_dim)))
        s2 = jnp.pad(s2, ((0, 0), (0, K_pad - in_dim)))
        wt = jnp.pad(wt, ((0, K_pad - in_dim), (0, N_pad - out_dim)))
        b2 = jnp.pad(b2, ((0, 0), (0, N_pad - out_dim)))

        grid = (M_pad // tm_sel, N_pad // tn_sel, K_pad // tk_sel)
        cost = pl.CostEstimate(
            flops=flops, transcendentals=0,
            bytes_accessed=(grid[1] * M_pad * K_pad * x_isz
                            + grid[0] * K_pad * N_pad * c_isz
                            + M_pad * N_pad * o_isz
                            + K_pad * 4 + N_pad * 4))
        vmem_limit = int(min(vmem_cap,
                             max(32 * 1024 * 1024,
                                 2 * fp_ksplit(tm_sel, tn_sel, tk_sel))))

        out2 = pl.pallas_call(
            _scaling_linear_kernel_ksplit,
            out_shape=jax.ShapeDtypeStruct((M_pad, N_pad), out_dtype),
            grid_spec=pltpu.PrefetchScalarGridSpec(
                num_scalar_prefetch=0,
                grid=grid,
                in_specs=[
                    pl.BlockSpec((tm_sel, tk_sel), lambda i, j, k: (i, k)),
                    pl.BlockSpec((1, tk_sel), lambda i, j, k: (0, k)),
                    pl.BlockSpec((tk_sel, tn_sel), lambda i, j, k: (k, j)),
                    pl.BlockSpec((1, tn_sel), lambda i, j, k: (0, j)),
                ],
                out_specs=pl.BlockSpec((tm_sel, tn_sel), lambda i, j, k: (i, j)),
                scratch_shapes=[pltpu.VMEM((tm_sel, tn_sel), jnp.float32)],
            ),
            compiler_params=pltpu.CompilerParams(
                dimension_semantics=("parallel", "parallel", "arbitrary"),
                vmem_limit_bytes=vmem_limit,
            ),
            cost_estimate=cost,
        )(x2, s2, wt, b2)

    out2 = out2[:M, :out_dim]
    return out2.reshape(orig_shape[:-1] + (out_dim,))


if __name__ == "__main__":
    key = jax.random.PRNGKey(0)
    k = jax.random.split(key, 8)

    # --- Case 1: default auto path (small frozen W -> fully VMEM-resident) ---
    B, S = 2, 8
    in_dim, out_dim = 32, 64
    x = jax.random.normal(k[0], (B, S, in_dim), dtype=jnp.float32)
    w = jax.random.normal(k[1], (out_dim, in_dim), dtype=jnp.float32) * 0.1
    b = jax.random.normal(k[2], (out_dim,), dtype=jnp.float32) * 0.1
    in_scaler = 1.0 + 0.1 * jax.random.normal(k[3], (in_dim,), dtype=jnp.float32)

    out = jax.block_until_ready(scaling_adapter_forward(x, in_scaler, w, b))
    ref = (x * in_scaler) @ w.T + b
    assert out.shape == (B, S, out_dim)
    assert jnp.allclose(out, ref, atol=5e-2, rtol=5e-2), float(
        jnp.max(jnp.abs(out - ref)))

    # --- Case 2: exercise the K-split code path (wide-adapter regime) --------
    in2, od2 = 256, 128
    xk = jax.random.normal(k[4], (B, S, in2), dtype=jnp.float32)
    wk = jax.random.normal(k[5], (od2, in2), dtype=jnp.float32) * 0.05
    bk = jax.random.normal(k[6], (od2,), dtype=jnp.float32) * 0.1
    sk = 1.0 + 0.1 * jax.random.normal(k[7], (in2,), dtype=jnp.float32)

    out_k = jax.block_until_ready(
        scaling_adapter_forward(xk, sk, wk, bk, tk=128, _force_path="ksplit"))
    ref_k = (xk * sk) @ wk.T + bk
    assert out_k.shape == (B, S, od2)
    assert jnp.allclose(out_k, ref_k, atol=5e-2, rtol=5e-2), float(
        jnp.max(jnp.abs(out_k - ref_k)))

    print("KERNEL_OK")
</pallas_src>

<mosaic_0001>
module attributes {stable_mosaic.version = 11 : i64} {
  func.func @_scaling_linear_kernel(%arg0: i32, %arg1: i32, %arg2: memref<16x32xf32, #tpu.memory_space<vmem>>, %arg3: memref<1x32xf32, #tpu.memory_space<vmem>>, %arg4: memref<32x128xbf16, #tpu.memory_space<vmem>>, %arg5: memref<1x128xf32, #tpu.memory_space<vmem>>, %arg6: memref<16x128xf32, #tpu.memory_space<vmem>>, %arg7: memref<16x32xbf16, #tpu.memory_space<vmem>>) attributes {dimension_semantics = [#tpu.dimension_semantics<parallel>, #tpu.dimension_semantics<arbitrary>], iteration_bounds = array<i64: 1, 1>, scalar_prefetch = 0 : i64, scratch_operands = 1 : i64, tpu.core_type = #tpu.core_type<tc>, window_params = [{transform_indices = @transform_0, window_bounds = array<i64: 16, 32>}, {pipeline_mode = #tpu.pipeline_mode<synchronous>, transform_indices = @transform_1, window_bounds = array<i64: 1, 32>}, {transform_indices = @transform_2, window_bounds = array<i64: 32, 128>}, {transform_indices = @transform_3, window_bounds = array<i64: 1, 128>}, {transform_indices = @transform_4, window_bounds = array<i64: 16, 128>}]} {
    %c0_i32 = arith.constant 0 : i32
    %0 = arith.cmpi eq, %arg1, %c0_i32 : i32
    %1 = arith.extui %0 : i1 to i32
    %c0_i32_0 = arith.constant 0 : i32
    %2 = arith.cmpi ne, %1, %c0_i32_0 : i32
    scf.if %2 {
      %c0_8 = arith.constant 0 : index
      %c0_9 = arith.constant 0 : index
      %10 = vector.load %arg2[%c0_8, %c0_9] : memref<16x32xf32, #tpu.memory_space<vmem>>, vector<16x32xf32>
      %c0_10 = arith.constant 0 : index
      %c0_11 = arith.constant 0 : index
      %11 = vector.load %arg3[%c0_10, %c0_11] : memref<1x32xf32, #tpu.memory_space<vmem>>, vector<1x32xf32>
      %12 = vector.broadcast %11 : vector<1x32xf32> to vector<16x32xf32>
      %13 = arith.mulf %10, %12 : vector<16x32xf32>
      %14 = arith.truncf %13 : vector<16x32xf32> to vector<16x32xbf16>
      %c0_12 = arith.constant 0 : index
      %c0_13 = arith.constant 0 : index
      %15 = vector.load %arg7[%c0_12, %c0_13] : memref<16x32xbf16, #tpu.memory_space<vmem>>, vector<16x32xbf16>
      tpu.vector_store %arg7[%c0_12, %c0_13], %14 {strides = array<i32>} : memref<16x32xbf16, #tpu.memory_space<vmem>>, vector<16x32xbf16>,
    } else {
    }
    %c0 = arith.constant 0 : index
    %c0_1 = arith.constant 0 : index
    %3 = vector.load %arg7[%c0, %c0_1] : memref<16x32xbf16, #tpu.memory_space<vmem>>, vector<16x32xbf16>
    %c0_2 = arith.constant 0 : index
    %c0_3 = arith.constant 0 : index
    %4 = vector.load %arg4[%c0_2, %c0_3] : memref<32x128xbf16, #tpu.memory_space<vmem>>, vector<32x128xbf16>
    %cst = arith.constant dense<0.000000e+00> : vector<16x128xf32>
    %5 = tpu.matmul %3, %4, %cst {dimension_numbers = #tpu.dot_dimension_numbers<[1], [0], [0], [1], [0, 0, 1, 1], [], []>} : vector<16x32xbf16>, vector<32x128xbf16>, vector<16x128xf32> -> vector<16x128xf32>
    %c0_4 = arith.constant 0 : index
    %c0_5 = arith.constant 0 : index
    %6 = vector.load %arg5[%c0_4, %c0_5] : memref<1x128xf32, #tpu.memory_space<vmem>>, vector<1x128xf32>
    %7 = vector.broadcast %6 : vector<1x128xf32> to vector<16x128xf32>
    %8 = arith.addf %5, %7 : vector<16x128xf32>
    %c0_6 = arith.constant 0 : index
    %c0_7 = arith.constant 0 : index
    %9 = vector.load %arg6[%c0_6, %c0_7] : memref<16x128xf32, #tpu.memory_space<vmem>>, vector<16x128xf32>
    tpu.vector_store %arg6[%c0_6, %c0_7], %8 {strides = array<i32>} : memref<16x128xf32, #tpu.memory_space<vmem>>, vector<16x128xf32>,
    return
  }
  func.func @transform_0(%arg0: i32, %arg1: i32) -> (i32, i32) {
    %c0_i32 = arith.constant 0 : i32
    %c0_i32_0 = arith.constant 0 : i32
    return %arg0, %c0_i32 : i32, i32
  }
  func.func @transform_1(%arg0: i32, %arg1: i32) -> (i32, i32) {
    %c0_i32 = arith.constant 0 : i32
    %c0_i32_0 = arith.constant 0 : i32
    %c0_i32_1 = arith.constant 0 : i32
    return %c0_i32, %c0_i32_0 : i32, i32
  }
  func.func @transform_2(%arg0: i32, %arg1: i32) -> (i32, i32) {
    %c0_i32 = arith.constant 0 : i32
    %c0_i32_0 = arith.constant 0 : i32
    return %c0_i32, %arg1 : i32, i32
  }
  func.func @transform_3(%arg0: i32, %arg1: i32) -> (i32, i32) {
    %c0_i32 = arith.constant 0 : i32
    %c0_i32_0 = arith.constant 0 : i32
    return %c0_i32, %arg1 : i32, i32
  }
  func.func @transform_4(%arg0: i32, %arg1: i32) -> (i32, i32) {
    %c0_i32 = arith.constant 0 : i32
    return %arg0, %arg1 : i32, i32
  }
}

</mosaic_0001>

<bundles_post_ra>
// kernel: tpu_custom_call.1
= control target key start
LH: loop header
LB: loop body
LE: loop exit
PB: predicated region body
PF: predicated region fallthrough
CT: control target
= control target key end

     0   :  { %9 = vsyncpa [#allocation4], 0  ;;  %s335_s0 = inlined_call_operand.hbm [shape: f32[16,32], index: 0, kind: input, shape index: {}]   ;;  %s336_s1 = inlined_call_operand.vmem [shape: f32[1,32], index: 1, kind: input, shape index: {}]   ;;  %s337_s2 = inlined_call_operand.hbm [shape: bf16[32,128], index: 2, kind: input, shape index: {}]   ;;  %s338_s3 = inlined_call_operand.vmem [shape: f32[1,128], index: 3, kind: input, shape index: {}]   ;;  %s339_s4 = inlined_call_operand.hbm [shape: f32[16,128], index: 4, kind: output, shape index: {}]  }
   0x1   :  { %10 = vsyncpa [#allocation7], 0 }
   0x2   :  { %11 = vsyncpa [#allocation5], 0  ;;  %s253_s15 = smov [#allocation3]   ;;  %s181_s19 = scalar_lea.hbm %s335_s0, 256 }
   0x3   :  { %s17_s16 = sshll.u32 %s253_s15, 4  ;;  %p182_p0 = scmp.ne.s32.totalorder %s335_s0, %s181_s19  ;;  %s18_s16 = int_to_ptr.vmem [resolvable:$true] %s17_s16 }
   0x4   :  { %p185_p1 = scmp.lt.u32.totalorder %s181_s19, %s335_s0 }
   0x6   :  { %p187_p2 = pnand %p185_p1, %p182_p0 }
   0x8   :  { %190 = shalt.err (!%p187_p2)
}
   0x9   :  { %s191_s24 = scalar_lea.vmem %s18_s16, 256  ;;  %p196_p4 = scmp.lt.s32.totalorder %s18_s16, %s18_s16 }
   0xa   :  { %p192_p3 = scmp.ne.s32.totalorder %s18_s16, %s191_s24  ;;  %p197_p5 = scmp.lt.s32.totalorder %s191_s24, %s191_s24 }
   0xc   :  { %p198_p6 = por %p197_p5, %p196_p4 }
   0xe   :  { %p199_p7 = pnand %p198_p6, %p192_p3 }
  0x10   :  { %202 = shalt.err (!%p199_p7)
}
  0x11   :  { %s254_s25 = smov 128   ;;  %s255_s26 = smov 8  }
  0x12   :  { %23 = dma.hbm_to_vmem [thread:$0]  %s335_s0, 256, %s18_s16, [#allocation4], %s254_s25, %s254_s25, %s255_s26  }
  0x13   :  { %s256_s29 = smov [#allocation6]   ;;  %s203_s7 = scalar_lea.hbm %s337_s2, 256 }
  0x14   :  { %s31_s30 = sshll.u32 %s256_s29, 4  ;;  %p204_p8 = scmp.ne.s32.totalorder %s337_s2, %s203_s7  ;;  %s32_s30 = int_to_ptr.vmem [resolvable:$true] %s31_s30 }
  0x15   :  { %p207_p9 = scmp.lt.u32.totalorder %s203_s7, %s337_s2 }
  0x17   :  { %p209_p10 = pnand %p207_p9, %p204_p8 }
  0x19   :  { %212 = shalt.err (!%p209_p10)
}
  0x1a   :  { %s213_s12 = scalar_lea.vmem %s32_s30, 256  ;;  %p218_p12 = scmp.lt.s32.totalorder %s32_s30, %s32_s30 }
  0x1b   :  { %p214_p11 = scmp.ne.s32.totalorder %s32_s30, %s213_s12  ;;  %p219_p13 = scmp.lt.s32.totalorder %s213_s12, %s213_s12 }
  0x1d   :  { %p220_p0 = por %p219_p13, %p218_p12 }
  0x1f   :  { %p221_p1 = pnand %p220_p0, %p214_p11 }
  0x21   :  { %224 = shalt.err (!%p221_p1)
}
  0x22   :  { %s257_s0 = smov 64   ;;  %s258_s13 = smov 4  }
  0x23   :  { %37 = dma.hbm_to_vmem [thread:$0]  %s337_s2, 256, %s32_s30, [#allocation7], %s257_s0, %s257_s0, %s258_s13  }
  0x24   :  { %247 = dma.done.wait [#allocation4], 256  }
  0x25   :  { %248 = vsyncadd [#allocation4], 4294967040 }
  0x26   :  { %249 = dma.done.wait [#allocation7], 256  }
  0x27   :  { %250 = vsyncadd [#allocation7], 4294967040  ;;  %v259_v0 = vmov 0.0   ;;  %vm260_vm0 = vmmov 0   ;;  %v179_v1 = vld [vmem:[#allocation6] sm:$0xff]   ;;  %v180_v2 = vld [vmem:[#allocation6 + $0x8] sm:$0xff]  }
  0x28   :  { %162 = vmatprep.subr.bf16.mxu0 %v259_v0  ;;  %166 = vmatprep.mubr.msk.bf16.mxu0 %vm260_vm0, %v259_v0  ;;  %v51_v3 = vld [vmem:[#allocation3] sm:$0xff]  ;;  %v52_v4 = vld [vmem:[#allocation3 + $0x8] sm:$0xff]  ;;  %v154_v5 = vld [vmem:[%s336_s1] ss:$0 sm:$0xff]  ;;  %vm63_vm1 = vcmask 261120   ;;  %s261_s19 = smov [#allocation8]  }
  0x29   :  { %163 = vmatpush3.bf16.msra.mxu0 %v179_v1  ;;  %v60_v6 = vmul.f32 %v154_v5, %v51_v3  ;;  %v61_v7 = vmul.f32 %v154_v5, %v52_v4  ;;  %v155_v10 = vld [vmem:[%s338_s3] ss:$0 sm:$0xff]  ;;  %s141_s20 = sshll.u32 %s261_s19, 4  ;;  %s142_s20 = int_to_ptr.vmem [resolvable:$true] %s141_s20 }
  0x2a   :  { %164 = vmatprep.subr.bf16.mxu0 %v259_v0  ;;  %s225_s1 = scalar_lea.vmem %s142_s20, 256  ;;  %p230_p3 = scmp.lt.s32.totalorder %s142_s20, %s142_s20 }
  0x2b   :  { %v62_v8 = vpack.c.bf16 %v61_v7, %v60_v6  ;;  %p226_p2 = scmp.ne.s32.totalorder %s142_s20, %s225_s1  ;;  %p231_p4 = scmp.lt.s32.totalorder %s225_s1, %s225_s1 }
  0x2d   :  { %165 = vmatpush3.bf16.msra.mxu0 %v180_v2  ;;  %64 = vst.msk [vmem:[#allocation2] sm:$0xff] %vm63_vm1, %v62_v8  ;;  %p232_p5 = por %p231_p4, %p230_p3 }
  0x2f   :  { %p233_p6 = pnand %p232_p5, %p226_p2 }
  0x34   :  { %v65_v9 = vld [vmem:[#allocation2] sm:$0xff] }
  0x35   :  { %167 = vmatmul.mubr.msk.bf16.vlgmr.msra.gmra.mrb[0].mxu0 %vm63_vm1, %v65_v9 }
 0x108   :  { %v127_v11 = vpop.f32.mrb[0].mxu0 }
 0x109   :  { %v128_v12 = vadd.f32 %v155_v10, %v127_v11  ;;  %v168_v13 = vpop.f32.mrb[1].mxu0 }
 0x10a   :  { %v130_v14 = vpop.f32.mrb[2].mxu0 }
 0x10b   :  { %134 = vst [vmem:[#allocation8] sm:$0xff] %v128_v12  ;;  %v131_v15 = vadd.f32 %v155_v10, %v130_v14  ;;  %v169_v16 = vpop.f32.mrb[3].mxu0 }
 0x10d   :  { %135 = vst [vmem:[#allocation8 + $0x8] sm:$0xff] %v131_v15 }
 0x10e   :  { %236 = shalt.err (!%p233_p6)
}
 0x10f   :  { %s237_s22 = scalar_lea.hbm %s339_s4, 256 }
 0x110   :  { %p238_p7 = scmp.ne.s32.totalorder %s339_s4, %s237_s22  ;;  %p241_p8 = scmp.lt.u32.totalorder %s237_s22, %s339_s4 }
 0x112   :  { %p243_p9 = pnand %p241_p8, %p238_p7 }
 0x114   :  { %246 = shalt.err (!%p243_p9)
}
 0x115   :  { %147 = dma.vmem_to_hbm [thread:$0]  %s142_s20, 256, %s339_s4, [#allocation5], %s254_s25, %s254_s25, %s255_s26  }
 0x116   :  { %251 = dma.done.wait [#allocation5], 256  }
 0x117   :  { %252 = vsyncadd [#allocation5], 4294967040 }
 0x118   :  { %151 = vsyncpa [#allocation4], 1 }
 0x119   :  { %152 = vsyncpa [#allocation7], 1 }
 0x11a   :  { %153 = vsyncpa [#allocation5], 1 }

</bundles_post_ra>
